<compile_context>
chip_gen: v5e
topology: v5e:2x2
jax: 0.10.0
libtpu: 0.0.40
codegen_flags: <defaults>
</compile_context>

<pallas_src>
import functools

import jax
import jax.numpy as jnp
import numpy as np
from jax.experimental import pallas as pl
from jax.experimental.pallas import tpu as pltpu


# ----------------------------- Pallas kernel ------------------------------- #
def _patch_merge_kernel(x4_ref, aux_ref, w4_ref, auxw_ref, pb_ref, ab_ref, o_ref):
    """One batch element: fused 4-way merge + projection + aux projection + cat."""
    n4 = x4_ref.shape[1]
    out_dim = o_ref.shape[-1]

    # Main projection: Linear(4*in_dim, out_dim) on merged patches, expressed
    # as the sum of 4 partial matmuls against the K-slices of the weight (no
    # materialized (n4, 4*d) gather). bf16 operands -> native MXU rate; f32 acc.
    acc = jnp.zeros((n4, out_dim), jnp.float32)
    for j in range(4):  # static 4-iteration loop -> 4 MXU matmuls
        acc = acc + jnp.dot(
            x4_ref[j].astype(jnp.bfloat16),
            w4_ref[j],
            preferred_element_type=jnp.float32,
        )
    main = acc + pb_ref[...]  # bias add stays f32 on the VPU (v5e-safe)

    # Aux-token projection (tiny, but fused: no extra launch / HBM round trip).
    aux = (
        jnp.dot(
            aux_ref[...].astype(jnp.bfloat16),
            auxw_ref[...],
            preferred_element_type=jnp.float32,
        )
        + ab_ref[...]
    )

    # Write the final concatenated layout directly: row 0 = aux, rows 1.. = main.
    o_ref[...] = jnp.concatenate([aux, main], axis=0).astype(o_ref.dtype)


# --------------------------- VMEM budget helpers ---------------------------- #
def _vmem_budget_bytes():
    """Generation-aware VMEM budget (v5e/v6e ~128 MiB, v7x 64 MiB per core)."""
    phys = None
    try:
        phys = getattr(pltpu.get_tpu_info(), "vmem_capacity_bytes", None)
    except Exception:
        phys = None
    if not phys:
        phys = 64 * (1 << 20)  # conservative fallback: v7x per-core VMEM
    return int(phys) * 3 // 4  # leave headroom for Mosaic internal scratch


def _fused_vmem_bytes(n4, d, out_dim, act_bytes):
    """Rough per-core VMEM footprint of the fused kernel (double-buffered)."""
    nbuf = 2  # Pallas double-buffers every operand by default
    acts = nbuf * (4 * n4 * d + d) * act_bytes        # x4 + aux blocks
    wgts = nbuf * (4 * d * out_dim + d * out_dim) * 2  # bf16 weights
    bias = nbuf * 2 * out_dim * 4
    outs = nbuf * (n4 + 1) * out_dim * act_bytes
    work = 2 * (n4 + 1) * out_dim * 4                  # f32 accumulator slack
    return acts + wgts + bias + outs + work


# ------------------------------ kernel wrapper ------------------------------ #
def fused_patch_merge_projection(x4, aux, params):
    """y[b] = concat([aux[b] @ aux_w + aux_b,
                      sum_j x4[b, j] @ proj_w4[j] + proj_b], axis=0)."""
    b, four, n4, d = x4.shape
    assert four == 4
    w4, auxw = params["proj_w4"], params["aux_w"]
    pb = params["proj_b"].reshape(1, -1).astype(jnp.float32)
    ab = params["aux_b"].reshape(1, -1).astype(jnp.float32)
    out_dim = w4.shape[-1]
    out_dtype = x4.dtype

    budget = _vmem_budget_bytes()
    need = _fused_vmem_bytes(n4, d, out_dim, x4.dtype.itemsize)
    if need > budget:
        # TODO(synk): add a K/N/M-tiled variant (reduction grid axis + f32 VMEM
        # accumulator) for configs whose resident weight/activation block does
        # not fit VMEM; the module's 8x8 patch grid (<=64 tokens) never hits it.
        raise NotImplementedError(
            f"fused PatchMerging block needs ~{need} B VMEM > budget {budget} B"
        )

    return pl.pallas_call(
        _patch_merge_kernel,
        out_shape=jax.ShapeDtypeStruct((b, n4 + 1, out_dim), out_dtype),
        grid=(b,),
        in_specs=[
            # Per-batch activation blocks; trailing dims are full-extent so any
            # (n4, d) is layout-legal.
            pl.BlockSpec((None, 4, n4, d), lambda bi: (bi, 0, 0, 0)),
            pl.BlockSpec((None, 1, d), lambda bi: (bi, 0, 0)),
            # Weights / biases: constant block index -> fetched once, resident.
            # (On v7x, pipeline_mode=pl.Buffered(1) would single-buffer these
            #  invariants and free VMEM for larger activation blocks.)
            pl.BlockSpec((4, d, out_dim), lambda bi: (0, 0, 0)),
            pl.BlockSpec((d, out_dim), lambda bi: (0, 0)),
            pl.BlockSpec((1, out_dim), lambda bi: (0, 0)),
            pl.BlockSpec((1, out_dim), lambda bi: (0, 0)),
        ],
        # Output is written directly in the final concatenated layout (no XLA
        # concatenate pass over the projected tokens).
        out_specs=pl.BlockSpec((None, n4 + 1, out_dim), lambda bi: (bi, 0, 0)),
        compiler_params=pltpu.CompilerParams(
            # batch >= 2 -> >= 2 parallel grid steps -> both v7x TensorCores
            dimension_semantics=("parallel",),
            vmem_limit_bytes=int(budget),
        ),
    )(x4, aux, w4, auxw, pb, ab)


# ------------------------------ glue / module ------------------------------- #
def init_params(key, in_dim, out_dim):
    k1, k2, k3, k4 = jax.random.split(key, 4)
    # Projection weight stored pre-transposed and pre-split into its four
    # (in_dim, out_dim) K-slices, in bfloat16 (native MXU operand dtype, half
    # the HBM bytes); biases stay f32.
    proj_w_t = jax.random.normal(k1, (4 * in_dim, out_dim), jnp.float32) * 0.02
    aux_w_t = jax.random.normal(k3, (in_dim, out_dim), jnp.float32) * 0.02
    return {
        "proj_w4": proj_w_t.reshape(4, in_dim, out_dim).astype(jnp.bfloat16),
        "proj_b": jax.random.normal(k2, (out_dim,), jnp.float32) * 0.02,
        "aux_w": aux_w_t.astype(jnp.bfloat16),
        "aux_b": jax.random.normal(k4, (out_dim,), jnp.float32) * 0.02,
    }


def patch_merging_forward(x, params, *, mode="1d", patch_size=4):
    """Matches PatchMerging.forward for mode in {'1d', '2d'}."""
    aux = x[:, -1:, :]  # (b, 1, in_dim)
    xm = x[:, :-1, :]   # (b, n, in_dim)
    b, n, d = xm.shape
    assert n % 4 == 0
    n4 = n // 4

    if mode == "1d":
        # einops 'b (p1 p2 n) d -> b n (p1 p2 d)': the j-th d-chunk of merged
        # token t is xm[:, j*n4 + t, :], so a FREE dim-split gives the kernel
        # exactly the 4 operands it needs -- no transpose / extra HBM pass.
        x4 = xm.reshape(b, 4, n4, d)
    elif mode == "2d":
        old_p = patch_size // 2
        H = W = 8 // old_p  # module hard-codes an 8x8 original grid
        assert n == H * W, f"2d mode expects n == {H * W}, got {n}"
        # TODO(synk): this tiny (<=64-token) transpose could also be fused via
        # four per-(p1,p2) BlockSpecs on the (b,H//2,2,W//2,2,d) view; only the
        # '1d' mode can have a large token count, so it stays in XLA here.
        x4 = (
            xm.reshape(b, H // 2, 2, W // 2, 2, d)
            .transpose(0, 2, 4, 1, 3, 5)  # (b, p1, p2, h, w, d)
            .reshape(b, 4, n4, d)
        )
    else:
        # TODO(synk): 'cnn' mode needs DepthwiseSeparable2d, which is not part
        # of the provided module source; no faithful implementation possible.
        raise NotImplementedError("cnn mode not implemented")

    return fused_patch_merge_projection(x4, aux, params)


# ------------------------------ pure-jnp reference --------------------------- #
def _merge_1d(xm):
    # einops: 'b (p1 p2 n) d -> b n (p1 p2 d)', p1=2, p2=2
    b, n, d = xm.shape
    n4 = n // 4
    xr = xm.reshape(b, 2, 2, n4, d).transpose(0, 3, 1, 2, 4)
    return xr.reshape(b, n4, 4 * d)


def _merge_2d(xm, patch_size):
    # einops: 'b (h w) d -> b d h w' ; 'b d (h p1)(w p2) -> b (h w) (p1 p2 d)'
    b, n, d = xm.shape
    old_p = patch_size // 2
    H = W = 8 // old_p
    assert n == H * W
    xr = xm.reshape(b, H // 2, 2, W // 2, 2, d).transpose(0, 1, 3, 2, 4, 5)
    return xr.reshape(b, (H // 2) * (W // 2), 4 * d)


def patch_merging_reference(x, params, *, mode="1d", patch_size=4):
    """Mirrors the PyTorch forward (same bf16 rounding of MXU operands)."""
    rd = lambda a: a.astype(jnp.bfloat16).astype(jnp.float32)
    aux = x[:, -1:, :]
    xm = x[:, :-1, :]
    d = xm.shape[-1]
    xr = _merge_1d(xm) if mode == "1d" else _merge_2d(xm, patch_size)
    out_dim = params["proj_w4"].shape[-1]
    w = params["proj_w4"].astype(jnp.float32).reshape(4 * d, out_dim)
    hi = jax.lax.Precision.HIGHEST
    x_proj = jnp.einsum("bnk,ko->bno", rd(xr), w, precision=hi) + params["proj_b"]
    aux_proj = (
        jnp.einsum("bnk,ko->bno", rd(aux), params["aux_w"].astype(jnp.float32),
                   precision=hi)
        + params["aux_b"]
    )
    return jnp.concatenate([aux_proj, x_proj], axis=1)


# ----------------------------------- main ------------------------------------ #
if __name__ == "__main__":
    key = jax.random.PRNGKey(0)
    kx, kp = jax.random.split(key)

    batch = 2
    in_dim = 32
    out_dim = 128        # multiple of 128 -> lane-dense (unmasked) output stores
    patch_size = 4       # old_p = 2 -> the module's 8x8 grid becomes 4x4 = 16 patches
    n_patches = 16       # divisible by 4 ('1d') and == 4*4 ('2d')
    seq = n_patches + 1  # +1 aux token (module slices it off)

    x = jax.random.normal(kx, (batch, seq, in_dim), jnp.float32)
    params = init_params(kp, in_dim, out_dim)

    ok = True
    for mode in ("1d", "2d"):
        fwd = jax.jit(
            functools.partial(patch_merging_forward, mode=mode, patch_size=patch_size)
        )
        out = jax.block_until_ready(fwd(x, params))
        ref = patch_merging_reference(x, params, mode=mode, patch_size=patch_size)
        assert out.shape == (batch, 1 + n_patches // 4, out_dim), out.shape
        if not np.allclose(
            np.asarray(out, np.float32), np.asarray(ref, np.float32),
            atol=2e-3, rtol=2e-3,
        ):
            ok = False

    if ok:
        print("KERNEL_OK")
</pallas_src>

<mosaic_0001>
module attributes {stable_mosaic.version = 11 : i64} {
  func.func @_patch_merge_kernel(%arg0: i32, %arg1: memref<1x4x4x32xf32, #tpu.memory_space<vmem>>, %arg2: memref<1x1x32xf32, #tpu.memory_space<vmem>>, %arg3: memref<4x32x128xbf16, #tpu.memory_space<vmem>>, %arg4: memref<32x128xbf16, #tpu.memory_space<vmem>>, %arg5: memref<1x128xf32, #tpu.memory_space<vmem>>, %arg6: memref<1x128xf32, #tpu.memory_space<vmem>>, %arg7: memref<1x5x128xf32, #tpu.memory_space<vmem>>) attributes {dimension_semantics = [#tpu.dimension_semantics<parallel>], iteration_bounds = array<i64: 2>, scalar_prefetch = 0 : i64, scratch_operands = 0 : i64, tpu.core_type = #tpu.core_type<tc>, window_params = [{transform_indices = @transform_0, window_bounds = array<i64: 1, 4, 4, 32>}, {transform_indices = @transform_1, window_bounds = array<i64: 1, 1, 32>}, {pipeline_mode = #tpu.pipeline_mode<synchronous>, transform_indices = @transform_2, window_bounds = array<i64: 4, 32, 128>}, {pipeline_mode = #tpu.pipeline_mode<synchronous>, transform_indices = @transform_3, window_bounds = array<i64: 32, 128>}, {pipeline_mode = #tpu.pipeline_mode<synchronous>, transform_indices = @transform_4, window_bounds = array<i64: 1, 128>}, {pipeline_mode = #tpu.pipeline_mode<synchronous>, transform_indices = @transform_5, window_bounds = array<i64: 1, 128>}, {transform_indices = @transform_6, window_bounds = array<i64: 1, 5, 128>}]} {
    %cst = arith.constant 0.000000e+00 : f32
    %0 = vector.broadcast %cst : f32 to vector<4x128xf32>
    %c0 = arith.constant 0 : index
    %c0_0 = arith.constant 0 : index
    %c0_1 = arith.constant 0 : index
    %c0_2 = arith.constant 0 : index
    %1 = vector.load %arg1[%c0, %c0_0, %c0_1, %c0_2] : memref<1x4x4x32xf32, #tpu.memory_space<vmem>>, vector<1x1x4x32xf32>
    %2 = vector.shape_cast %1 : vector<1x1x4x32xf32> to vector<4x32xf32>
    %3 = arith.truncf %2 : vector<4x32xf32> to vector<4x32xbf16>
    %c0_3 = arith.constant 0 : index
    %c0_4 = arith.constant 0 : index
    %c0_5 = arith.constant 0 : index
    %4 = vector.load %arg3[%c0_3, %c0_4, %c0_5] : memref<4x32x128xbf16, #tpu.memory_space<vmem>>, vector<1x32x128xbf16>
    %5 = vector.shape_cast %4 : vector<1x32x128xbf16> to vector<32x128xbf16>
    %cst_6 = arith.constant dense<0.000000e+00> : vector<4x128xf32>
    %6 = tpu.matmul %3, %5, %cst_6 {dimension_numbers = #tpu.dot_dimension_numbers<[1], [0], [0], [1], [0, 0, 1, 1], [], []>} : vector<4x32xbf16>, vector<32x128xbf16>, vector<4x128xf32> -> vector<4x128xf32>
    %7 = arith.addf %0, %6 : vector<4x128xf32>
    %c0_7 = arith.constant 0 : index
    %c1 = arith.constant 1 : index
    %c0_8 = arith.constant 0 : index
    %c0_9 = arith.constant 0 : index
    %8 = vector.load %arg1[%c0_7, %c1, %c0_8, %c0_9] : memref<1x4x4x32xf32, #tpu.memory_space<vmem>>, vector<1x1x4x32xf32>
    %9 = vector.shape_cast %8 : vector<1x1x4x32xf32> to vector<4x32xf32>
    %10 = arith.truncf %9 : vector<4x32xf32> to vector<4x32xbf16>
    %c1_10 = arith.constant 1 : index
    %c0_11 = arith.constant 0 : index
    %c0_12 = arith.constant 0 : index
    %11 = vector.load %arg3[%c1_10, %c0_11, %c0_12] : memref<4x32x128xbf16, #tpu.memory_space<vmem>>, vector<1x32x128xbf16>
    %12 = vector.shape_cast %11 : vector<1x32x128xbf16> to vector<32x128xbf16>
    %cst_13 = arith.constant dense<0.000000e+00> : vector<4x128xf32>
    %13 = tpu.matmul %10, %12, %cst_13 {dimension_numbers = #tpu.dot_dimension_numbers<[1], [0], [0], [1], [0, 0, 1, 1], [], []>} : vector<4x32xbf16>, vector<32x128xbf16>, vector<4x128xf32> -> vector<4x128xf32>
    %14 = arith.addf %7, %13 : vector<4x128xf32>
    %c0_14 = arith.constant 0 : index
    %c2 = arith.constant 2 : index
    %c0_15 = arith.constant 0 : index
    %c0_16 = arith.constant 0 : index
    %15 = vector.load %arg1[%c0_14, %c2, %c0_15, %c0_16] : memref<1x4x4x32xf32, #tpu.memory_space<vmem>>, vector<1x1x4x32xf32>
    %16 = vector.shape_cast %15 : vector<1x1x4x32xf32> to vector<4x32xf32>
    %17 = arith.truncf %16 : vector<4x32xf32> to vector<4x32xbf16>
    %c2_17 = arith.constant 2 : index
    %c0_18 = arith.constant 0 : index
    %c0_19 = arith.constant 0 : index
    %18 = vector.load %arg3[%c2_17, %c0_18, %c0_19] : memref<4x32x128xbf16, #tpu.memory_space<vmem>>, vector<1x32x128xbf16>
    %19 = vector.shape_cast %18 : vector<1x32x128xbf16> to vector<32x128xbf16>
    %cst_20 = arith.constant dense<0.000000e+00> : vector<4x128xf32>
    %20 = tpu.matmul %17, %19, %cst_20 {dimension_numbers = #tpu.dot_dimension_numbers<[1], [0], [0], [1], [0, 0, 1, 1], [], []>} : vector<4x32xbf16>, vector<32x128xbf16>, vector<4x128xf32> -> vector<4x128xf32>
    %21 = arith.addf %14, %20 : vector<4x128xf32>
    %c0_21 = arith.constant 0 : index
    %c3 = arith.constant 3 : index
    %c0_22 = arith.constant 0 : index
    %c0_23 = arith.constant 0 : index
    %22 = vector.load %arg1[%c0_21, %c3, %c0_22, %c0_23] : memref<1x4x4x32xf32, #tpu.memory_space<vmem>>, vector<1x1x4x32xf32>
    %23 = vector.shape_cast %22 : vector<1x1x4x32xf32> to vector<4x32xf32>
    %24 = arith.truncf %23 : vector<4x32xf32> to vector<4x32xbf16>
    %c3_24 = arith.constant 3 : index
    %c0_25 = arith.constant 0 : index
    %c0_26 = arith.constant 0 : index
    %25 = vector.load %arg3[%c3_24, %c0_25, %c0_26] : memref<4x32x128xbf16, #tpu.memory_space<vmem>>, vector<1x32x128xbf16>
    %26 = vector.shape_cast %25 : vector<1x32x128xbf16> to vector<32x128xbf16>
    %cst_27 = arith.constant dense<0.000000e+00> : vector<4x128xf32>
    %27 = tpu.matmul %24, %26, %cst_27 {dimension_numbers = #tpu.dot_dimension_numbers<[1], [0], [0], [1], [0, 0, 1, 1], [], []>} : vector<4x32xbf16>, vector<32x128xbf16>, vector<4x128xf32> -> vector<4x128xf32>
    %28 = arith.addf %21, %27 : vector<4x128xf32>
    %c0_28 = arith.constant 0 : index
    %c0_29 = arith.constant 0 : index
    %29 = vector.load %arg5[%c0_28, %c0_29] : memref<1x128xf32, #tpu.memory_space<vmem>>, vector<1x128xf32>
    %30 = vector.broadcast %29 : vector<1x128xf32> to vector<4x128xf32>
    %31 = arith.addf %28, %30 : vector<4x128xf32>
    %c0_30 = arith.constant 0 : index
    %c0_31 = arith.constant 0 : index
    %c0_32 = arith.constant 0 : index
    %32 = vector.load %arg2[%c0_30, %c0_31, %c0_32] : memref<1x1x32xf32, #tpu.memory_space<vmem>>, vector<1x1x32xf32>
    %33 = vector.shape_cast %32 : vector<1x1x32xf32> to vector<1x32xf32>
    %34 = arith.truncf %33 : vector<1x32xf32> to vector<1x32xbf16>
    %c0_33 = arith.constant 0 : index
    %c0_34 = arith.constant 0 : index
    %35 = vector.load %arg4[%c0_33, %c0_34] : memref<32x128xbf16, #tpu.memory_space<vmem>>, vector<32x128xbf16>
    %cst_35 = arith.constant dense<0.000000e+00> : vector<1x128xf32>
    %36 = tpu.matmul %34, %35, %cst_35 {dimension_numbers = #tpu.dot_dimension_numbers<[1], [0], [0], [1], [0, 0, 1, 1], [], []>} : vector<1x32xbf16>, vector<32x128xbf16>, vector<1x128xf32> -> vector<1x128xf32>
    %c0_36 = arith.constant 0 : index
    %c0_37 = arith.constant 0 : index
    %37 = vector.load %arg6[%c0_36, %c0_37] : memref<1x128xf32, #tpu.memory_space<vmem>>, vector<1x128xf32>
    %38 = arith.addf %36, %37 : vector<1x128xf32>
    %39 = tpu.concatenate %38, %31 in 0 : vector<1x128xf32>, vector<4x128xf32> -> vector<5x128xf32>
    %c0_38 = arith.constant 0 : index
    %c0_39 = arith.constant 0 : index
    %c0_40 = arith.constant 0 : index
    %40 = vector.load %arg7[%c0_38, %c0_39, %c0_40] : memref<1x5x128xf32, #tpu.memory_space<vmem>>, vector<1x5x128xf32>
    %41 = vector.shape_cast %40 : vector<1x5x128xf32> to vector<5x128xf32>
    %42 = vector.shape_cast %39 : vector<5x128xf32> to vector<1x5x128xf32>
    tpu.vector_store %arg7[%c0_38, %c0_39, %c0_40], %42 {strides = array<i32>} : memref<1x5x128xf32, #tpu.memory_space<vmem>>, vector<1x5x128xf32>,
    return
  }
  func.func @transform_0(%arg0: i32) -> (i32, i32, i32, i32) {
    %c0_i32 = arith.constant 0 : i32
    %c0_i32_0 = arith.constant 0 : i32
    %c0_i32_1 = arith.constant 0 : i32
    %c0_i32_2 = arith.constant 0 : i32
    return %arg0, %c0_i32, %c0_i32_0, %c0_i32_1 : i32, i32, i32, i32
  }
  func.func @transform_1(%arg0: i32) -> (i32, i32, i32) {
    %c0_i32 = arith.constant 0 : i32
    %c0_i32_0 = arith.constant 0 : i32
    %c0_i32_1 = arith.constant 0 : i32
    return %arg0, %c0_i32, %c0_i32_0 : i32, i32, i32
  }
  func.func @transform_2(%arg0: i32) -> (i32, i32, i32) {
    %c0_i32 = arith.constant 0 : i32
    %c0_i32_0 = arith.constant 0 : i32
    %c0_i32_1 = arith.constant 0 : i32
    %c0_i32_2 = arith.constant 0 : i32
    return %c0_i32, %c0_i32_0, %c0_i32_1 : i32, i32, i32
  }
  func.func @transform_3(%arg0: i32) -> (i32, i32) {
    %c0_i32 = arith.constant 0 : i32
    %c0_i32_0 = arith.constant 0 : i32
    %c0_i32_1 = arith.constant 0 : i32
    return %c0_i32, %c0_i32_0 : i32, i32
  }
  func.func @transform_4(%arg0: i32) -> (i32, i32) {
    %c0_i32 = arith.constant 0 : i32
    %c0_i32_0 = arith.constant 0 : i32
    %c0_i32_1 = arith.constant 0 : i32
    return %c0_i32, %c0_i32_0 : i32, i32
  }
  func.func @transform_5(%arg0: i32) -> (i32, i32) {
    %c0_i32 = arith.constant 0 : i32
    %c0_i32_0 = arith.constant 0 : i32
    %c0_i32_1 = arith.constant 0 : i32
    return %c0_i32, %c0_i32_0 : i32, i32
  }
  func.func @transform_6(%arg0: i32) -> (i32, i32, i32) {
    %c0_i32 = arith.constant 0 : i32
    %c0_i32_0 = arith.constant 0 : i32
    %c0_i32_1 = arith.constant 0 : i32
    return %arg0, %c0_i32, %c0_i32_0 : i32, i32, i32
  }
}

</mosaic_0001>

<bundles_post_ra>
// kernel: patch_merging_forward.1
= control target key start
LH: loop header
LB: loop body
LE: loop exit
PB: predicated region body
PF: predicated region fallthrough
CT: control target
= control target key end

     0   :  { %s651_s21 = smov 0   ;;  %s717_s0 = inlined_call_operand.vmem [shape: f32[2,4,4,32], index: 0, kind: input, shape index: {}]   ;;  %s718_s1 = inlined_call_operand.vmem [shape: f32[2,1,32], index: 1, kind: input, shape index: {}]   ;;  %s719_s2 = inlined_call_operand.vmem [shape: bf16[4,32,128], index: 2, kind: input, shape index: {}]   ;;  %s720_s3 = inlined_call_operand.vmem [shape: bf16[32,128], index: 3, kind: input, shape index: {}]   ;;  %s721_s4 = inlined_call_operand.vmem [shape: f32[1,128], index: 4, kind: input, shape index: {}]   ;;  %s722_s5 = inlined_call_operand.vmem [shape: f32[1,128], index: 5, kind: input, shape index: {}]   ;;  %s723_s6 = inlined_call_operand.vmem [shape: f32[2,5,128], index: 6, kind: output, shape index: {}]  }
   0x1 LB: > { %s518_s22 = sadd.s32 4294967295, %s614_s21   ;;  %p522_p0 = scmp.ge.s32.totalorder %s614_s21, 1  ;;  %s614_s21 = sphi %s651_s21, %s16_s21  }
   0x2   : > { %p220_p1 = scmp.lt.s32.totalorder %s614_s21, 3 }
   0x4   : > { %p221_p2 = pnand %p522_p0, %p220_p1 }
   0x5   : > { %p252_p3 = scmp.lt.s32.totalorder (!%p221_p2), %s518_s22, 1 }
   0x6   : > { %224 = sbr.rel (%p221_p2) target bundleno = 169 (0xa9), region = 44 }
   0xb   : > { %v592_v0 = vld [vmem:[%s719_s2 + $0x18] sm:$0xff]  ;;  %v590_v1 = vld [vmem:[%s719_s2 + $0x8] sm:$0xff]  ;;  %v591_v4 = vld [vmem:[%s719_s2 + $0x10] sm:$0xff]  ;;  %s725_s22 = smov (!%p252_p3, %s518_s22), 1  ;;  %vm291_vm0 = vcmask 261120   ;;  %vm453_vm1 = vcmask 1040384  }
   0xc   : > { %v594_v2 = vld [vmem:[%s719_s2 + $0x28] sm:$0xff]  ;;  %v596_v3 = vld [vmem:[%s719_s2 + $0x38] sm:$0xff]  ;;  %301 = vmatpush.bf16.msra.mxu0 %v592_v0  ;;  %329 = vmatpush.bf16.msra.mxu1 %v590_v1  ;;  %v589_v5 = vld [vmem:[%s719_s2] sm:$0xff]  ;;  %s588_s15 = sshll.u32 %s725_s22, 4  ;;  %s259_s27 = scalar_lea.vmem %s718_s1, %s725_s22 }
   0xd   : > { %365 = vmatpush.bf16.msra.mxu2 %v594_v2  ;;  %402 = vmatpush.bf16.msra.mxu3 %v596_v3  ;;  %v593_v6 = vld [vmem:[%s719_s2 + $0x20] sm:$0xff]  ;;  %v595_v7 = vld [vmem:[%s719_s2 + $0x30] sm:$0xff]  ;;  %v598_v8 = vld [vmem:[%s720_s3 + $0x8] sm:$0xff]  ;;  %s256_s20 = scalar_lea.vmem %s717_s0, %s588_s15  ;;  %s525_s30 = sshll.u32 %s725_s22, 3 }
   0xe   : > { %v526_v9 = vld [vmem:[%s256_s20 + $0x4] sm:$0xf]  ;;  %v265_v10 = vld [vmem:[%s256_s20] sm:$0xf]  ;;  %v549_v11 = vld [vmem:[%s256_s20 + $0x8] sm:$0xf]  ;;  %s263_s11 = scalar_lea.vmem %s723_s6, %s525_s30 }
   0xf   : > { %v273_v12 = vpack.c.bf16 %v526_v9, %v526_v9  ;;  %v266_v13 = vpack.c.bf16 %v265_v10, %v265_v10  ;;  %v338_v14 = vpack.c.bf16 %v549_v11, %v549_v11  ;;  %v563_v15 = vld [vmem:[%s256_s20 + $0xc] sm:$0xf]  ;;  %v597_v17 = vld [vmem:[%s720_s3] sm:$0xff] }
  0x10   : > { %302 = vmatpush.bf16.msra.mxu0 %v591_v4  ;;  %330 = vmatpush.bf16.msra.mxu1 %v589_v5  ;;  %v375_v16 = vpack.c.bf16 %v563_v15, %v563_v15  ;;  %v415_v18 = vld [vmem:[%s259_s27] sm:$0x1] }
  0x11   : > { %366 = vmatpush.bf16.msra.mxu2 %v593_v6  ;;  %403 = vmatpush.bf16.msra.mxu3 %v595_v7  ;;  %v416_v19 = vpack.c.bf16 %v415_v18, %v415_v18  ;;  %v607_v28 = vld [vmem:[%s721_s4] ss:$0 sm:$0xff] }
  0x12   : > { %v421_v31 = vld [vmem:[%s722_s5] sm:$0x1] }
  0x13   : > { %539 = vmatmul.msk.bf16.vlgmr.msra.gmra.mxu0 %vm291_vm0, %v273_v12  ;;  %548 = vmatmul.msk.bf16.vlgmr.msra.gmra.mxu1 %vm291_vm0, %v266_v13 }
  0x14   : > { %443 = vmatpush.bf16.msrb.mxu0 %v598_v8  ;;  %562 = vmatmul.msk.bf16.vlgmr.msra.gmra.mxu2 %vm291_vm0, %v338_v14 }
  0x15   : > { %576 = vmatmul.msk.bf16.vlgmr.msra.gmra.mxu3 %vm291_vm0, %v375_v16 }
  0x18   : > { %444 = vmatpush.bf16.msrb.mxu0 %v597_v17 }
  0x23   : > { %585 = vmatmul.msk.bf16.vlgmr.msrb.gmra.mxu0 %vm291_vm0, %v416_v19 }
  0x90   : > { %v304_v20 = vpop.f32.mrf.mxu0  ;;  %v332_v21 = vpop.f32.mrf.mxu1 }
  0x91   : > { %v333_v22 = vadd.f32 %v332_v21, %v304_v20 }
  0x97   : > { %v368_v23 = vpop.f32.mrf.mxu2 }
  0x98   : > { %v405_v24 = vpop.f32.mrf.mxu3  ;;  %v372_v25 = vadd.f32 %v368_v23, %v333_v22  ;;  %v306_v26 = vpop.f32.mrf.mxu0 }
  0x99   : > { %v334_v27 = vpop.f32.mrf.mxu1 }
  0x9a   : > { %v409_v29 = vadd.f32 %v405_v24, %v372_v25 }
  0x9c   : > { %v414_v30 = vadd.f32 %v607_v28, %v409_v29 }
  0x9e   : > { %v451_v35 = vrot.slane %v414_v30, 7 }
  0x9f   : > { %v370_v32 = vpop.f32.mrf.mxu2 }
  0xa0   : > { %v407_v33 = vpop.f32.mrf.mxu3  ;;  %v446_v34 = vpop.f32.mrf.mxu0 }
  0xa1   : > { %v447_v36 = vadd.f32 %v446_v34, %v421_v31 }
  0xa3   : > { %v454_v37 = vsel %vm453_vm1, %v447_v36, %v451_v35 }
  0xa4   : > { %455 = vst [vmem:[%s263_s11] sm:$0x1f] %v454_v37 }
  0xa8   : > { %v448_v38 = vpop.f32.mrf.mxu0 }
  0xa9 PF: > { %s16_s21 = sadd.s32 1, %s614_s21  }
  0xaa   : > { %p13_p4 = scmp.ge.s32.totalorder %s16_s21, 4  }
  0xac   :  { %15 = sbr.rel (!%p13_p4) target bundleno = 1 (0x1), region = 83 }

</bundles_post_ra>
